<compile_context>
chip_gen: v7x
topology: tpu7x:2x2x1
jax: 0.10.0
libtpu: 0.0.40
codegen_flags: <defaults>
</compile_context>

<pallas_src>
import functools
import math

import jax
import jax.numpy as jnp
from jax.experimental import pallas as pl
from jax.experimental.pallas import tpu as pltpu


LANE = 128
SUBLANE = 8
MAX_BATCH_TILE = 256


def _round_up(x, m):
    return ((x + m - 1) // m) * m


# ---------------------------------------------------------------------------
# Fused Pallas kernel: full MLP (input + n_mid hidden + head) + per-head activations.
# ---------------------------------------------------------------------------
def _fused_predictor_kernel(x_ref, w_in_ref, b_in_ref, w_mid_ref, b_mid_ref,
                            w_head_ref, b_head_ref, o_ref, *, n_mid, act_segments):
    # input block: Linear (bf16 MXU, f32 accumulate) + LeakyReLU(0.2)
    h = jnp.dot(x_ref[...].astype(jnp.bfloat16), w_in_ref[...],
                preferred_element_type=jnp.float32)
    h = h + b_in_ref[...]
    h = jnp.maximum(h, 0.2 * h)

    # pyramid blocks: Linear + LeakyReLU(0.2)   (static unrolled loop, all in VMEM)
    for i in range(n_mid):
        h = jnp.dot(h.astype(jnp.bfloat16), w_mid_ref[i],
                    preferred_element_type=jnp.float32)
        h = h + b_mid_ref[i]
        h = jnp.maximum(h, 0.2 * h)

    # head: Linear, no final activation (output lane dim padded to 128)
    out = jnp.dot(h.astype(jnp.bfloat16), w_head_ref[...],
                  preferred_element_type=jnp.float32)
    out = out + b_head_ref[...]

    # GeneralizedPredictorModel per-chunk activations, applied via lane masks so the
    # output stays a single lane-dense slab (padded lanes untouched, sliced off outside).
    col = jax.lax.broadcasted_iota(jnp.int32, out.shape, dimension=1)
    for (start, dim, act) in act_segments:
        if act is None:
            continue
        if act == "tanh":
            a = jnp.tanh(out)
        elif act == "sigmoid":
            a = jax.nn.sigmoid(out)
        else:
            raise ValueError(f"unsupported activation {act!r}")
        mask = (col >= start) & (col < start + dim)
        out = jnp.where(mask, a, out)

    o_ref[...] = out.astype(o_ref.dtype)


def fused_predictor_call(kernel_params, x_padded, *, n_mid, act_segments,
                         input_dim, nz_mid, sum_out, dout_pad, tile_b):
    B_pad = x_padded.shape[0]
    assert B_pad % tile_b == 0
    grid = (B_pad // tile_b,)

    kernel = functools.partial(_fused_predictor_kernel,
                               n_mid=n_mid, act_segments=act_segments)

    # Advisory cost estimate for XLA scheduling around the custom call.
    flops = 2 * B_pad * (input_dim * nz_mid + n_mid * nz_mid * nz_mid + nz_mid * sum_out)
    transcendentals = B_pad * sum(d for (_, d, a) in act_segments if a is not None)
    weight_bytes = 2 * (input_dim * nz_mid + n_mid * nz_mid * nz_mid + nz_mid * dout_pad)
    bias_bytes = 4 * (nz_mid * (n_mid + 1) + dout_pad)
    bytes_accessed = 4 * B_pad * input_dim + weight_bytes + bias_bytes + 4 * B_pad * dout_pad

    return pl.pallas_call(
        kernel,
        out_shape=jax.ShapeDtypeStruct((B_pad, dout_pad), jnp.float32),
        grid=grid,
        in_specs=[
            pl.BlockSpec((tile_b, input_dim), lambda i: (i, 0)),           # x (batch-tiled)
            pl.BlockSpec((input_dim, nz_mid), lambda i: (0, 0)),           # w_in   (bf16)
            pl.BlockSpec((1, nz_mid), lambda i: (0, 0)),                   # b_in   (f32)
            pl.BlockSpec((n_mid, nz_mid, nz_mid), lambda i: (0, 0, 0)),    # w_mid  (bf16)
            pl.BlockSpec((n_mid, 1, nz_mid), lambda i: (0, 0, 0)),         # b_mid  (f32)
            pl.BlockSpec((nz_mid, dout_pad), lambda i: (0, 0)),            # w_head (bf16)
            pl.BlockSpec((1, dout_pad), lambda i: (0, 0)),                 # b_head (f32)
        ],
        out_specs=pl.BlockSpec((tile_b, dout_pad), lambda i: (i, 0)),
        compiler_params=pltpu.CompilerParams(
            dimension_semantics=("parallel",)),                            # megacore on v7x
        cost_estimate=pl.CostEstimate(flops=flops,
                                      transcendentals=transcendentals,
                                      bytes_accessed=bytes_accessed),
    )(x_padded, *kernel_params)


# ---------------------------------------------------------------------------
# Parameter construction (xavier_uniform weights, small random biases).
# Weights are stored bf16 and UNpadded on the contraction dims; only the head output
# lane dim is padded to dout_pad.  Returns (kernel params, reference params).
# ---------------------------------------------------------------------------
def build_params(key, input_dim, nz_mid, n_layers, sum_out, dout_pad):
    def xavier(k, fan_in, fan_out):
        limit = math.sqrt(6.0 / (fan_in + fan_out))
        return jax.random.uniform(k, (fan_in, fan_out), jnp.float32, -limit, limit)

    keys = jax.random.split(key, 2 * (n_layers + 2))
    wk, bk = keys[:n_layers + 2], keys[n_layers + 2:]

    w_in = xavier(wk[0], input_dim, nz_mid)
    w_mid = [xavier(wk[1 + i], nz_mid, nz_mid) for i in range(n_layers)]
    w_head = xavier(wk[n_layers + 1], nz_mid, sum_out)

    b_in = 0.01 * jax.random.normal(bk[0], (1, nz_mid), jnp.float32)
    b_mid = [0.01 * jax.random.normal(bk[1 + i], (1, nz_mid), jnp.float32)
             for i in range(n_layers)]
    b_head = 0.01 * jax.random.normal(bk[n_layers + 1], (1, sum_out), jnp.float32)

    # bf16 weights for the kernel; only the head's OUTPUT lane dim is zero-padded.
    w_in_k = w_in.astype(jnp.bfloat16)
    w_mid_k = jnp.stack([w.astype(jnp.bfloat16) for w in w_mid])
    w_head_k = (jnp.zeros((nz_mid, dout_pad), jnp.bfloat16)
                .at[:, :sum_out].set(w_head.astype(jnp.bfloat16)))
    b_in_k = b_in
    b_mid_k = jnp.stack(b_mid)
    b_head_k = jnp.zeros((1, dout_pad), jnp.float32).at[:, :sum_out].set(b_head)
    # guardrail: padded head-bias lanes must stay exactly zero (matters if real
    # checkpoint biases are loaded into these buffers later).
    assert bool(jnp.all(b_head_k[:, sum_out:] == 0.0))

    kernel_params = (w_in_k, b_in_k, w_mid_k, b_mid_k, w_head_k, b_head_k)
    ref_params = (w_in_k, b_in, [w_mid_k[i] for i in range(n_layers)], b_mid,
                  w_head_k[:, :sum_out], b_head)
    return kernel_params, ref_params


# ---------------------------------------------------------------------------
# Forward wrapper (== GeneralizedPredictorModel.forward) and pure-JAX reference.
# ---------------------------------------------------------------------------
def make_forward(output_dims, activations, n_mid, input_dim, nz_mid, dout_pad):
    segs, idx = [], 0
    for d, a in zip(output_dims, activations):
        segs.append((idx, d, a))
        idx += d
    segs = tuple(segs)
    sum_out = idx

    @jax.jit
    def forward(kernel_params, x):
        B = x.shape[0]
        B_pad = _round_up(max(B, SUBLANE), SUBLANE)
        tile_b = B_pad if B_pad <= MAX_BATCH_TILE else MAX_BATCH_TILE
        B_pad = _round_up(B_pad, tile_b)
        x_padded = jnp.zeros((B_pad, input_dim), x.dtype).at[:B].set(x)

        out = fused_predictor_call(kernel_params, x_padded, n_mid=n_mid,
                                   act_segments=segs, input_dim=input_dim,
                                   nz_mid=nz_mid, sum_out=sum_out,
                                   dout_pad=dout_pad, tile_b=tile_b)
        out = out[:B]
        outs, cur = [], 0
        for d, _ in zip(output_dims, activations):
            o = out[:, cur:cur + d]
            if d == 1:
                o = o.reshape(-1)          # PyTorch: output.view(-1) when output_dim == 1
            outs.append(o)
            cur += d
        return outs[0] if len(outs) == 1 else outs

    return forward


def reference_forward(ref_params, x, output_dims, activations):
    """Pure-JAX reference mirroring the kernel's bf16-weight / f32-accumulate path."""
    w_in, b_in, w_mid, b_mid, w_head, b_head = ref_params

    def bdot(a, b):
        return jax.lax.dot(a.astype(jnp.bfloat16), b.astype(jnp.bfloat16),
                           preferred_element_type=jnp.float32)

    h = bdot(x, w_in) + b_in
    h = jnp.maximum(h, 0.2 * h)
    for w, b in zip(w_mid, b_mid):
        h = bdot(h, w) + b
        h = jnp.maximum(h, 0.2 * h)
    out = bdot(h, w_head) + b_head
    outs, cur = [], 0
    for d, a in zip(output_dims, activations):
        o = out[:, cur:cur + d]
        if a == "tanh":
            o = jnp.tanh(o)
        elif a == "sigmoid":
            o = jax.nn.sigmoid(o)
        if d == 1:
            o = o.reshape(-1)
        outs.append(o)
        cur += d
    return outs[0] if len(outs) == 1 else outs


# TODO(synk): `detached` (gradient stop on the input) and `dropout` are training-time
# options with no effect on this inference forward pass and are not implemented.

if __name__ == "__main__":
    # hp: nz_mid=32, n_processing_layers=3; model with three heads and mixed activations.
    hp = dict(nz_mid=32, n_processing_layers=3)
    input_dim = 32
    output_dims = (8, 4, 1)
    activations = (None, "tanh", "sigmoid")
    B = 2

    sum_out = sum(output_dims)
    dout_pad = _round_up(sum_out, LANE)       # 128 — lane-dense head output width

    key = jax.random.PRNGKey(0)
    kparam, kinput = jax.random.split(key)
    kernel_params, ref_params = build_params(
        kparam, input_dim, hp["nz_mid"], hp["n_processing_layers"], sum_out, dout_pad)

    x = jax.random.normal(kinput, (B, input_dim), jnp.float32)

    forward = make_forward(output_dims, activations, hp["n_processing_layers"],
                           input_dim, hp["nz_mid"], dout_pad)
    outs = forward(kernel_params, x)
    jax.block_until_ready(outs)

    # shape checks (chunk with output_dim==1 is flattened, like the PyTorch module)
    assert outs[0].shape == (B, output_dims[0])
    assert outs[1].shape == (B, output_dims[1])
    assert outs[2].shape == (B,)

    # numerical check against a pure-JAX reference of the same (bf16-weight) MLP
    refs = reference_forward(ref_params, x, output_dims, activations)
    for o, r in zip(outs, refs):
        assert o.shape == r.shape
        assert bool(jnp.all(jnp.isfinite(o)))
        assert bool(jnp.allclose(o, r, atol=1e-4, rtol=1e-4))

    print("KERNEL_OK")
</pallas_src>

<mosaic_0001>
module attributes {stable_mosaic.version = 11 : i64} {
  func.func @_fused_predictor_kernel(%arg0: i32, %arg1: memref<8x32xf32, #tpu.memory_space<vmem>>, %arg2: memref<32x32xbf16, #tpu.memory_space<vmem>>, %arg3: memref<1x32xf32, #tpu.memory_space<vmem>>, %arg4: memref<3x32x32xbf16, #tpu.memory_space<vmem>>, %arg5: memref<3x1x32xf32, #tpu.memory_space<vmem>>, %arg6: memref<32x128xbf16, #tpu.memory_space<vmem>>, %arg7: memref<1x128xf32, #tpu.memory_space<vmem>>, %arg8: memref<8x128xf32, #tpu.memory_space<vmem>>) attributes {dimension_semantics = [#tpu.dimension_semantics<parallel>], iteration_bounds = array<i64: 1>, scalar_prefetch = 0 : i64, scratch_operands = 0 : i64, tpu.core_type = #tpu.core_type<tc>, window_params = [{transform_indices = @transform_0, window_bounds = array<i64: 8, 32>}, {pipeline_mode = #tpu.pipeline_mode<synchronous>, transform_indices = @transform_1, window_bounds = array<i64: 32, 32>}, {pipeline_mode = #tpu.pipeline_mode<synchronous>, transform_indices = @transform_2, window_bounds = array<i64: 1, 32>}, {pipeline_mode = #tpu.pipeline_mode<synchronous>, transform_indices = @transform_3, window_bounds = array<i64: 3, 32, 32>}, {pipeline_mode = #tpu.pipeline_mode<synchronous>, transform_indices = @transform_4, window_bounds = array<i64: 3, 1, 32>}, {pipeline_mode = #tpu.pipeline_mode<synchronous>, transform_indices = @transform_5, window_bounds = array<i64: 32, 128>}, {pipeline_mode = #tpu.pipeline_mode<synchronous>, transform_indices = @transform_6, window_bounds = array<i64: 1, 128>}, {transform_indices = @transform_7, window_bounds = array<i64: 8, 128>}]} {
    %c0 = arith.constant 0 : index
    %c0_0 = arith.constant 0 : index
    %0 = vector.load %arg1[%c0, %c0_0] : memref<8x32xf32, #tpu.memory_space<vmem>>, vector<8x32xf32>
    %1 = arith.truncf %0 : vector<8x32xf32> to vector<8x32xbf16>
    %c0_1 = arith.constant 0 : index
    %c0_2 = arith.constant 0 : index
    %2 = vector.load %arg2[%c0_1, %c0_2] : memref<32x32xbf16, #tpu.memory_space<vmem>>, vector<32x32xbf16>
    %cst = arith.constant dense<0.000000e+00> : vector<8x32xf32>
    %3 = tpu.matmul %1, %2, %cst {dimension_numbers = #tpu.dot_dimension_numbers<[1], [0], [0], [1], [0, 0, 1, 1], [], []>} : vector<8x32xbf16>, vector<32x32xbf16>, vector<8x32xf32> -> vector<8x32xf32>
    %c0_3 = arith.constant 0 : index
    %c0_4 = arith.constant 0 : index
    %4 = vector.load %arg3[%c0_3, %c0_4] : memref<1x32xf32, #tpu.memory_space<vmem>>, vector<1x32xf32>
    %5 = vector.broadcast %4 : vector<1x32xf32> to vector<8x32xf32>
    %6 = arith.addf %3, %5 : vector<8x32xf32>
    %cst_5 = arith.constant 2.000000e-01 : f32
    %7 = vector.broadcast %cst_5 : f32 to vector<8x32xf32>
    %8 = arith.mulf %7, %6 : vector<8x32xf32>
    %9 = arith.maximumf %6, %8 : vector<8x32xf32>
    %10 = arith.truncf %9 : vector<8x32xf32> to vector<8x32xbf16>
    %c0_6 = arith.constant 0 : index
    %c0_7 = arith.constant 0 : index
    %c0_8 = arith.constant 0 : index
    %11 = vector.load %arg4[%c0_6, %c0_7, %c0_8] : memref<3x32x32xbf16, #tpu.memory_space<vmem>>, vector<1x32x32xbf16>
    %12 = vector.shape_cast %11 : vector<1x32x32xbf16> to vector<32x32xbf16>
    %cst_9 = arith.constant dense<0.000000e+00> : vector<8x32xf32>
    %13 = tpu.matmul %10, %12, %cst_9 {dimension_numbers = #tpu.dot_dimension_numbers<[1], [0], [0], [1], [0, 0, 1, 1], [], []>} : vector<8x32xbf16>, vector<32x32xbf16>, vector<8x32xf32> -> vector<8x32xf32>
    %c0_10 = arith.constant 0 : index
    %c0_11 = arith.constant 0 : index
    %c0_12 = arith.constant 0 : index
    %14 = vector.load %arg5[%c0_10, %c0_11, %c0_12] : memref<3x1x32xf32, #tpu.memory_space<vmem>>, vector<1x1x32xf32>
    %15 = vector.shape_cast %14 : vector<1x1x32xf32> to vector<1x32xf32>
    %16 = vector.broadcast %15 : vector<1x32xf32> to vector<8x32xf32>
    %17 = arith.addf %13, %16 : vector<8x32xf32>
    %cst_13 = arith.constant 2.000000e-01 : f32
    %18 = vector.broadcast %cst_13 : f32 to vector<8x32xf32>
    %19 = arith.mulf %18, %17 : vector<8x32xf32>
    %20 = arith.maximumf %17, %19 : vector<8x32xf32>
    %21 = arith.truncf %20 : vector<8x32xf32> to vector<8x32xbf16>
    %c1 = arith.constant 1 : index
    %c0_14 = arith.constant 0 : index
    %c0_15 = arith.constant 0 : index
    %22 = vector.load %arg4[%c1, %c0_14, %c0_15] : memref<3x32x32xbf16, #tpu.memory_space<vmem>>, vector<1x32x32xbf16>
    %23 = vector.shape_cast %22 : vector<1x32x32xbf16> to vector<32x32xbf16>
    %cst_16 = arith.constant dense<0.000000e+00> : vector<8x32xf32>
    %24 = tpu.matmul %21, %23, %cst_16 {dimension_numbers = #tpu.dot_dimension_numbers<[1], [0], [0], [1], [0, 0, 1, 1], [], []>} : vector<8x32xbf16>, vector<32x32xbf16>, vector<8x32xf32> -> vector<8x32xf32>
    %c1_17 = arith.constant 1 : index
    %c0_18 = arith.constant 0 : index
    %c0_19 = arith.constant 0 : index
    %25 = vector.load %arg5[%c1_17, %c0_18, %c0_19] : memref<3x1x32xf32, #tpu.memory_space<vmem>>, vector<1x1x32xf32>
    %26 = vector.shape_cast %25 : vector<1x1x32xf32> to vector<1x32xf32>
    %27 = vector.broadcast %26 : vector<1x32xf32> to vector<8x32xf32>
    %28 = arith.addf %24, %27 : vector<8x32xf32>
    %cst_20 = arith.constant 2.000000e-01 : f32
    %29 = vector.broadcast %cst_20 : f32 to vector<8x32xf32>
    %30 = arith.mulf %29, %28 : vector<8x32xf32>
    %31 = arith.maximumf %28, %30 : vector<8x32xf32>
    %32 = arith.truncf %31 : vector<8x32xf32> to vector<8x32xbf16>
    %c2 = arith.constant 2 : index
    %c0_21 = arith.constant 0 : index
    %c0_22 = arith.constant 0 : index
    %33 = vector.load %arg4[%c2, %c0_21, %c0_22] : memref<3x32x32xbf16, #tpu.memory_space<vmem>>, vector<1x32x32xbf16>
    %34 = vector.shape_cast %33 : vector<1x32x32xbf16> to vector<32x32xbf16>
    %cst_23 = arith.constant dense<0.000000e+00> : vector<8x32xf32>
    %35 = tpu.matmul %32, %34, %cst_23 {dimension_numbers = #tpu.dot_dimension_numbers<[1], [0], [0], [1], [0, 0, 1, 1], [], []>} : vector<8x32xbf16>, vector<32x32xbf16>, vector<8x32xf32> -> vector<8x32xf32>
    %c2_24 = arith.constant 2 : index
    %c0_25 = arith.constant 0 : index
    %c0_26 = arith.constant 0 : index
    %36 = vector.load %arg5[%c2_24, %c0_25, %c0_26] : memref<3x1x32xf32, #tpu.memory_space<vmem>>, vector<1x1x32xf32>
    %37 = vector.shape_cast %36 : vector<1x1x32xf32> to vector<1x32xf32>
    %38 = vector.broadcast %37 : vector<1x32xf32> to vector<8x32xf32>
    %39 = arith.addf %35, %38 : vector<8x32xf32>
    %cst_27 = arith.constant 2.000000e-01 : f32
    %40 = vector.broadcast %cst_27 : f32 to vector<8x32xf32>
    %41 = arith.mulf %40, %39 : vector<8x32xf32>
    %42 = arith.maximumf %39, %41 : vector<8x32xf32>
    %43 = arith.truncf %42 : vector<8x32xf32> to vector<8x32xbf16>
    %c0_28 = arith.constant 0 : index
    %c0_29 = arith.constant 0 : index
    %44 = vector.load %arg6[%c0_28, %c0_29] : memref<32x128xbf16, #tpu.memory_space<vmem>>, vector<32x128xbf16>
    %cst_30 = arith.constant dense<0.000000e+00> : vector<8x128xf32>
    %45 = tpu.matmul %43, %44, %cst_30 {dimension_numbers = #tpu.dot_dimension_numbers<[1], [0], [0], [1], [0, 0, 1, 1], [], []>} : vector<8x32xbf16>, vector<32x128xbf16>, vector<8x128xf32> -> vector<8x128xf32>
    %c0_31 = arith.constant 0 : index
    %c0_32 = arith.constant 0 : index
    %46 = vector.load %arg7[%c0_31, %c0_32] : memref<1x128xf32, #tpu.memory_space<vmem>>, vector<1x128xf32>
    %47 = vector.broadcast %46 : vector<1x128xf32> to vector<8x128xf32>
    %48 = arith.addf %45, %47 : vector<8x128xf32>
    %49 = tpu.iota {dimensions = array<i32: 1>} : vector<8x128xi32>
    %50 = math.tanh %48 : vector<8x128xf32>
    %c8_i32 = arith.constant 8 : i32
    %51 = vector.broadcast %c8_i32 : i32 to vector<8x128xi32>
    %52 = arith.cmpi sge, %49, %51 : vector<8x128xi32>
    %c12_i32 = arith.constant 12 : i32
    %53 = vector.broadcast %c12_i32 : i32 to vector<8x128xi32>
    %54 = arith.cmpi slt, %49, %53 : vector<8x128xi32>
    %55 = arith.andi %52, %54 : vector<8x128xi1>
    %56 = arith.select %55, %50, %48 : vector<8x128xi1>, vector<8x128xf32>
    %57 = arith.negf %56 : vector<8x128xf32>
    %58 = math.exp %57 : vector<8x128xf32>
    %cst_33 = arith.constant 1.000000e+00 : f32
    %59 = vector.broadcast %cst_33 : f32 to vector<8x128xf32>
    %60 = arith.addf %59, %58 : vector<8x128xf32>
    %61 = arith.divf %59, %60 : vector<8x128xf32>
    %c12_i32_34 = arith.constant 12 : i32
    %62 = vector.broadcast %c12_i32_34 : i32 to vector<8x128xi32>
    %63 = arith.cmpi sge, %49, %62 : vector<8x128xi32>
    %c13_i32 = arith.constant 13 : i32
    %64 = vector.broadcast %c13_i32 : i32 to vector<8x128xi32>
    %65 = arith.cmpi slt, %49, %64 : vector<8x128xi32>
    %66 = arith.andi %63, %65 : vector<8x128xi1>
    %67 = arith.select %66, %61, %56 : vector<8x128xi1>, vector<8x128xf32>
    %c0_35 = arith.constant 0 : index
    %c0_36 = arith.constant 0 : index
    %68 = vector.load %arg8[%c0_35, %c0_36] : memref<8x128xf32, #tpu.memory_space<vmem>>, vector<8x128xf32>
    tpu.vector_store %arg8[%c0_35, %c0_36], %67 {strides = array<i32>} : memref<8x128xf32, #tpu.memory_space<vmem>>, vector<8x128xf32>,
    return
  }
  func.func @transform_0(%arg0: i32) -> (i32, i32) {
    %c0_i32 = arith.constant 0 : i32
    %c0_i32_0 = arith.constant 0 : i32
    return %arg0, %c0_i32 : i32, i32
  }
  func.func @transform_1(%arg0: i32) -> (i32, i32) {
    %c0_i32 = arith.constant 0 : i32
    %c0_i32_0 = arith.constant 0 : i32
    %c0_i32_1 = arith.constant 0 : i32
    return %c0_i32, %c0_i32_0 : i32, i32
  }
  func.func @transform_2(%arg0: i32) -> (i32, i32) {
    %c0_i32 = arith.constant 0 : i32
    %c0_i32_0 = arith.constant 0 : i32
    %c0_i32_1 = arith.constant 0 : i32
    return %c0_i32, %c0_i32_0 : i32, i32
  }
  func.func @transform_3(%arg0: i32) -> (i32, i32, i32) {
    %c0_i32 = arith.constant 0 : i32
    %c0_i32_0 = arith.constant 0 : i32
    %c0_i32_1 = arith.constant 0 : i32
    %c0_i32_2 = arith.constant 0 : i32
    return %c0_i32, %c0_i32_0, %c0_i32_1 : i32, i32, i32
  }
  func.func @transform_4(%arg0: i32) -> (i32, i32, i32) {
    %c0_i32 = arith.constant 0 : i32
    %c0_i32_0 = arith.constant 0 : i32
    %c0_i32_1 = arith.constant 0 : i32
    %c0_i32_2 = arith.constant 0 : i32
    return %c0_i32, %c0_i32_0, %c0_i32_1 : i32, i32, i32
  }
  func.func @transform_5(%arg0: i32) -> (i32, i32) {
    %c0_i32 = arith.constant 0 : i32
    %c0_i32_0 = arith.constant 0 : i32
    %c0_i32_1 = arith.constant 0 : i32
    return %c0_i32, %c0_i32_0 : i32, i32
  }
  func.func @transform_6(%arg0: i32) -> (i32, i32) {
    %c0_i32 = arith.constant 0 : i32
    %c0_i32_0 = arith.constant 0 : i32
    %c0_i32_1 = arith.constant 0 : i32
    return %c0_i32, %c0_i32_0 : i32, i32
  }
  func.func @transform_7(%arg0: i32) -> (i32, i32) {
    %c0_i32 = arith.constant 0 : i32
    %c0_i32_0 = arith.constant 0 : i32
    return %arg0, %c0_i32 : i32, i32
  }
}

</mosaic_0001>

<bundles_post_ra>
// kernel: forward.1
= control target key start
LH: loop header
LB: loop body
LE: loop exit
PB: predicated region body
PF: predicated region fallthrough
CT: control target
= control target key end

     0   :  { %12 = vsyncpa [#allocation3], 0  ;;  %s698_s0 = inlined_call_operand.vmem [shape: f32[8,32], index: 0, kind: input, shape index: {}]   ;;  %s699_s1 = inlined_call_operand.hbm [shape: bf16[32,32], index: 1, kind: input, shape index: {}]   ;;  %s700_s2 = inlined_call_operand.vmem [shape: f32[1,32], index: 2, kind: input, shape index: {}]   ;;  %s701_s3 = inlined_call_operand.hbm [shape: bf16[3,32,32], index: 3, kind: input, shape index: {}]   ;;  %s702_s4 = inlined_call_operand.vmem [shape: f32[3,1,32], index: 4, kind: input, shape index: {}]   ;;  %s703_s5 = inlined_call_operand.vmem [shape: bf16[32,128], index: 5, kind: input, shape index: {}]   ;;  %s704_s6 = inlined_call_operand.vmem [shape: f32[1,128], index: 6, kind: input, shape index: {}]   ;;  %s705_s7 = inlined_call_operand.vmem [shape: f32[8,128], index: 7, kind: output, shape index: {}]  }
   0x1   :  { %13 = vsyncpa [#allocation5], 0  ;;  %s576_s24 = smov [#allocation2]   ;;  %s528_s28 = scalar_lea.hbm %s699_s1, 256 }
   0x2   :  { %s21_s25 = sshll.u32 %s576_s24, 4  ;;  %p529_p0 = scmp.ne.s32.totalorder %s699_s1, %s528_s28  ;;  %s22_s25 = int_to_ptr.vmem [resolvable:$true] %s21_s25 }
   0x3   :  { %p532_p1 = scmp.lt.u32.totalorder %s528_s28, %s699_s1 }
   0x5   :  { %p534_p2 = pnand %p532_p1, %p529_p0 }
   0x7   :  { %537 = shalt.err (!%p534_p2)
}
   0x8   :  { %s538_s10 = scalar_lea.vmem %s22_s25, 256  ;;  %p543_p4 = scmp.lt.s32.totalorder %s22_s25, %s22_s25 }
   0x9   :  { %p539_p3 = scmp.ne.s32.totalorder %s22_s25, %s538_s10  ;;  %p544_p5 = scmp.lt.s32.totalorder %s538_s10, %s538_s10 }
   0xb   :  { %p545_p6 = por %p544_p5, %p543_p4 }
   0xd   :  { %p546_p7 = pnand %p545_p6, %p539_p3 }
   0xf   :  { %549 = shalt.err (!%p546_p7)
}
  0x10   :  { %s577_s11 = smov 64   ;;  %s578_s12 = smov 4  }
  0x11   :  { %27 = dma.hbm_to_vmem [thread:$0]  %s699_s1, 256, %s22_s25, [#allocation3], %s577_s11, %s577_s11, %s578_s12  }
  0x12   :  { %s579_s15 = smov [#allocation4]   ;;  %s550_s19 = scalar_lea.hbm %s701_s3, 768 }
  0x13   :  { %s35_s16 = sshll.u32 %s579_s15, 4  ;;  %p551_p8 = scmp.ne.s32.totalorder %s701_s3, %s550_s19  ;;  %s36_s16 = int_to_ptr.vmem [resolvable:$true] %s35_s16 }
  0x14   :  { %p554_p9 = scmp.lt.u32.totalorder %s550_s19, %s701_s3 }
  0x16   :  { %p556_p10 = pnand %p554_p9, %p551_p8 }
  0x18   :  { %559 = shalt.err (!%p556_p10)
}
  0x19   :  { %s560_s24 = scalar_lea.vmem %s36_s16, 768  ;;  %p565_p12 = scmp.lt.s32.totalorder %s36_s16, %s36_s16 }
  0x1a   :  { %p561_p11 = scmp.ne.s32.totalorder %s36_s16, %s560_s24  ;;  %p566_p13 = scmp.lt.s32.totalorder %s560_s24, %s560_s24 }
  0x1c   :  { %p567_p0 = por %p566_p13, %p565_p12 }
  0x1e   :  { %p568_p1 = pnand %p567_p0, %p561_p11 }
  0x20   :  { %571 = shalt.err (!%p568_p1)
}
  0x21   :  { %41 = dma.hbm_to_vmem [thread:$0]  %s701_s3, 768, %s36_s16, [#allocation5], %s577_s11, %s577_s11, %s578_s12  }
  0x22   :  { %572 = dma.done.wait [#allocation3], 256  }
  0x23   :  { %573 = vsyncadd [#allocation3], 4294967040 }
  0x24   :  { %574 = dma.done.wait [#allocation5], 768  }
  0x25   :  { %575 = vsyncadd [#allocation5], 4294966528  ;;  %v580_v0 = vmov 0.0   ;;  %vm581_vm0 = vmmov 0   ;;  %v512_v1 = vld [vmem:[#allocation2] sm:$0xff]   ;;  %v513_v2 = vld [vmem:[#allocation2 + $0x8] sm:$0xff]   ;;  %v404_v51 = vlaneseq }
  0x26   :  { %466 = vmatprep.subr.bf16.mxu0 %v580_v0  ;;  %470 = vmatprep.mubr.msk.bf16.mxu0 %vm581_vm0, %v580_v0  ;;  %v55_v3 = vld [vmem:[%s698_s0] sm:$0xff]  ;;  %vm80_vm1 = vcmask 261120   ;;  %v514_v5 = vld [vmem:[#allocation4] sm:$0xff]   ;;  %v515_v6 = vld [vmem:[#allocation4 + $0x8] sm:$0xff]  }
  0x27   :  { %474 = vmatprep.subr.bf16.mxu1 %v580_v0  ;;  %478 = vmatprep.mubr.msk.bf16.mxu1 %vm581_vm0, %v580_v0  ;;  %v56_v4 = vpack.c.bf16 %v55_v3, %v55_v3  ;;  %v428_v7 = vld [vmem:[%s700_s2] ss:$0 sm:$0xff]  ;;  %v517_v17 = vld [vmem:[#allocation4 + $0x18] sm:$0xff]   ;;  %v518_v27 = vld [vmem:[#allocation4 + $0x20] sm:$0xff]   ;;  %v405_v56 = vand.u32 127, %v404_v51 }
  0x28   :  { %467 = vmatpush3.bf16.msra.mxu0 %v512_v1  ;;  %475 = vmatpush3.bf16.msra.mxu1 %v514_v5  ;;  %v516_v16 = vld [vmem:[#allocation4 + $0x10] sm:$0xff]   ;;  %v519_v28 = vld [vmem:[#allocation4 + $0x28] sm:$0xff]   ;;  %v521_v39 = vld [vmem:[%s703_s5 + $0x8] sm:$0xff]  }
  0x29   :  { %468 = vmatprep.subr.bf16.mxu0 %v580_v0  ;;  %476 = vmatprep.subr.bf16.mxu1 %v580_v0  ;;  %v432_v18 = vld [vmem:[%s702_s4] ss:$0 sm:$0xff]  ;;  %v437_v29 = vld [vmem:[%s702_s4 + $0x1] ss:$0 sm:$0xff]  ;;  %v442_v40 = vld [vmem:[%s702_s4 + $0x2] ss:$0 sm:$0xff] }
  0x2a   :  { %v520_v38 = vld [vmem:[%s703_s5] sm:$0xff]   ;;  %vm407_vm2 = vcmp.ge.s32.totalorder %v405_v56, 8  ;;  %vm408_vm3 = vcmp.lt.s32.totalorder %v405_v56, 12  ;;  %vm417_vm5 = vcmp.ge.s32.totalorder %v405_v56, 12  ;;  %vm418_vm6 = vcmp.lt.s32.totalorder %v405_v56, 13 }
  0x2b   :  { %v446_v49 = vld [vmem:[%s704_s6] ss:$0 sm:$0xff]  ;;  %vm409_vm4 = vmand %vm407_vm2, %vm408_vm3 }
  0x2c   :  { %469 = vmatpush3.bf16.msra.mxu0 %v513_v2  ;;  %477 = vmatpush3.bf16.msra.mxu1 %v515_v6  ;;  %vm419_vm7 = vmand %vm417_vm5, %vm418_vm6 }
  0x2d   :  { %482 = vmatprep.subr.bf16.mxu0 %v580_v0  ;;  %490 = vmatprep.subr.bf16.mxu1 %v580_v0 }
  0x2f   :  { %471 = vmatmul.mubr.msk.bf16.vlgmr.msra.gmra.mrb[0].mxu0 %vm80_vm1, %v56_v4 }
  0x30   :  { %486 = vmatprep.mubr.msk.bf16.mxu0 %vm581_vm0, %v580_v0  ;;  %483 = vmatpush3.bf16.msra.mxu0 %v516_v16 }
  0x31   :  { %484 = vmatprep.subr.bf16.mxu0 %v580_v0 }
  0x34   :  { %485 = vmatpush3.bf16.msra.mxu0 %v517_v17 }
  0x35   :  { %498 = vmatprep.subr.bf16.mxu0 %v580_v0 }
 0x102   :  { %v118_v8 = vpop.f32.mrb[0].mxu0 }
 0x103   :  { %v119_v9 = vadd.f32 %v428_v7, %v118_v8  ;;  %v472_v10 = vpop.f32.mrb[1].mxu0 }
 0x104   :  { %v121_v11 = vpop.f32.mrb[2].mxu0 }
 0x105   :  { %v124_v12 = vmul.f32 0.2, %v119_v9  ;;  %v473_v13 = vpop.f32.mrb[3].mxu0 }
 0x107   :  { %v125_v14 = vmax.f32 %v119_v9, %v124_v12 }
 0x109   :  { %v126_v15 = vpack.c.bf16 %v125_v14, %v125_v14 }
 0x10b   :  { %479 = vmatmul.mubr.msk.bf16.vlgmr.msra.gmra.mrb[0].mxu1 %vm80_vm1, %v126_v15 }
 0x10c   :  { %494 = vmatprep.mubr.msk.bf16.mxu1 %vm581_vm0, %v580_v0  ;;  %491 = vmatpush3.bf16.msra.mxu1 %v518_v27 }
 0x10d   :  { %492 = vmatprep.subr.bf16.mxu1 %v580_v0 }
 0x110   :  { %493 = vmatpush3.bf16.msra.mxu1 %v519_v28 }
 0x1de   :  { %v187_v19 = vpop.f32.mrb[0].mxu1 }
 0x1df   :  { %v188_v20 = vadd.f32 %v432_v18, %v187_v19  ;;  %v480_v21 = vpop.f32.mrb[1].mxu1 }
 0x1e0   :  { %v190_v22 = vpop.f32.mrb[2].mxu1 }
 0x1e1   :  { %v193_v23 = vmul.f32 0.2, %v188_v20  ;;  %v481_v24 = vpop.f32.mrb[3].mxu1 }
 0x1e3   :  { %v194_v25 = vmax.f32 %v188_v20, %v193_v23 }
 0x1e5   :  { %v195_v26 = vpack.c.bf16 %v194_v25, %v194_v25 }
 0x1e7   :  { %487 = vmatmul.mubr.msk.bf16.vlgmr.msra.gmra.mrb[4].mxu0 %vm80_vm1, %v195_v26 }
 0x1e8   :  { %502 = vmatprep.mubr.msk.bf16.mxu0 %vm581_vm0, %v580_v0  ;;  %499 = vmatpush3.bf16.msra.mxu0 %v520_v38 }
 0x1e9   :  { %500 = vmatprep.subr.bf16.mxu0 %v580_v0 }
 0x1ec   :  { %501 = vmatpush3.bf16.msra.mxu0 %v521_v39 }
 0x2ba   :  { %v258_v30 = vpop.f32.mrb[4].mxu0 }
 0x2bb   :  { %v259_v31 = vadd.f32 %v437_v29, %v258_v30  ;;  %v488_v32 = vpop.f32.mrb[5].mxu0 }
 0x2bc   :  { %v261_v33 = vpop.f32.mrb[6].mxu0 }
 0x2bd   :  { %v264_v34 = vmul.f32 0.2, %v259_v31  ;;  %v489_v35 = vpop.f32.mrb[7].mxu0 }
 0x2bf   :  { %v265_v36 = vmax.f32 %v259_v31, %v264_v34 }
 0x2c1   :  { %v266_v37 = vpack.c.bf16 %v265_v36, %v265_v36 }
 0x2c3   :  { %495 = vmatmul.mubr.msk.bf16.vlgmr.msra.gmra.mrb[4].mxu1 %vm80_vm1, %v266_v37 }
 0x396   :  { %v329_v41 = vpop.f32.mrb[4].mxu1 }
 0x397   :  { %v330_v42 = vadd.f32 %v442_v40, %v329_v41  ;;  %v496_v43 = vpop.f32.mrb[5].mxu1 }
 0x398   :  { %v332_v44 = vpop.f32.mrb[6].mxu1 }
 0x399   :  { %v335_v45 = vmul.f32 0.2, %v330_v42  ;;  %v497_v46 = vpop.f32.mrb[7].mxu1 }
 0x39b   :  { %v336_v47 = vmax.f32 %v330_v42, %v335_v45 }
 0x39d   :  { %v337_v48 = vpack.c.bf16 %v336_v47, %v336_v47 }
 0x39f   :  { %503 = vmatmul.mubr.msk.bf16.vlgmr.msra.gmra.mrb[8].mxu0 %vm80_vm1, %v337_v48 }
 0x472   :  { %v398_v50 = vpop.f32.mrb[8].mxu0 }
 0x473   :  { %v399_v52 = vadd.f32 %v446_v49, %v398_v50  ;;  %v504_v53 = vpop.f32.mrb[9].mxu0 }
 0x474   :  { %v401_v54 = vpop.f32.mrb[10].mxu0 }
 0x475   :  { %522 = vtanh.f32 %v399_v52  ;;  %v505_v55 = vpop.f32.mrb[11].mxu0 }
 0x47f   :  { %v523_v57 = vpop.eup %522 }
 0x480   :  { %v410_v58 = vsel %vm409_vm4, %v523_v57, %v399_v52 }
 0x481   :  { %v450_v59 = vmul.f32 -1.442695, %v410_v58 }
 0x483   :  { %524 = vpow2.f32 %v450_v59 }
 0x48d   :  { %v525_v60 = vpop.eup %524 }
 0x48e   :  { %v414_v61 = vadd.f32 1.0, %v525_v60 }
 0x490   :  { %526 = vrcp.f32 %v414_v61 }
 0x49a   :  { %v527_v62 = vpop.eup %526 }
 0x49b   :  { %v420_v63 = vsel %vm419_vm7, %v527_v62, %v410_v58 }
 0x49c   :  { %421 = vst [vmem:[%s705_s7] sm:$0xff] %v420_v63 }
 0x49d   :  { %426 = vsyncpa [#allocation3], 1 }
 0x49e   :  { %427 = vsyncpa [#allocation5], 1 }

</bundles_post_ra>
